<compile_context>
chip_gen: v7x
topology: tpu7x:2x2x1
jax: 0.10.0
libtpu: 0.0.40
codegen_flags: <defaults>
</compile_context>

<pallas_src>
import jax
import jax.numpy as jnp
from jax.experimental import pallas as pl
from jax.experimental.pallas import tpu as pltpu


N_OBS = 23
N_HID = 128
N_ACT = 5
OUT_LANES = 128               # lane-dense output block (cols 0..4 = q_pre, 5 = row-sum(a))
MATMUL_DTYPE = jnp.bfloat16   # MXU-native; f32 accumulate keeps accuracy


def dueling_q_kernel(x_ref, w1_ref, b1_ref, wb_ref, bb_ref, wh_ref, bh_ref, out_ref):
    # x tile (tb, 23): cast to bf16 only at the MXU inputs.
    x = x_ref[...].astype(MATMUL_DTYPE)

    # fc1 + ReLU                                            (tb, 128)
    h = jnp.dot(x, w1_ref[...], preferred_element_type=jnp.float32) + b1_ref[...]
    h = jnp.maximum(h, 0.0)

    # fused [fc_value | fc_adv] + ReLU                      (tb, 256)
    hb = jnp.dot(h.astype(MATMUL_DTYPE), wb_ref[...],
                 preferred_element_type=jnp.float32) + bb_ref[...]
    hb = jnp.maximum(hb, 0.0)

    # fused heads WITH the dueling combine folded into the weights:
    #   col j (0..4) = v + a_j   (pre-mean q)
    #   col 5        = sum_j a_j (per-row advantage sum)
    #   cols 6..127  = 0         (padding for a dense 128-lane store)
    head = jnp.dot(hb.astype(MATMUL_DTYPE), wh_ref[...],
                   preferred_element_type=jnp.float32) + bh_ref[...]

    # single unmasked full-block store (lane-dense epilogue)
    out_ref[...] = head.astype(out_ref.dtype)


def _round_up(n, m):
    return ((n + m - 1) // m) * m


def _cdiv(a, b):
    return -(-a // b)


def dueling_qnet_forward(x, kparams):
    """x: (B, 23) float32.  kparams: output of prepare_params()."""
    w1, b1, wb, bb, wh, bh = kparams
    B = x.shape[0]

    # Large batch tile (fewer grid steps), but keep >= 2 tiles when B permits
    # so the "parallel" axis still splits across v7x's two TensorCores.
    tb = min(512, _round_up(max(_cdiv(B, 2), 1), 8))
    B_pad = _round_up(B, tb)
    if B_pad != B:                       # skipped entirely when tb divides B
        x = jnp.pad(x, ((0, B_pad - B), (0, 0)))
    grid = (B_pad // tb,)

    flops = int(2 * B_pad * (N_OBS * N_HID + N_HID * 2 * N_HID + 2 * N_HID * OUT_LANES))
    bytes_accessed = int(
        x.size * x.dtype.itemsize
        + sum(int(p.size) * p.dtype.itemsize for p in kparams)
        + B_pad * OUT_LANES * 4)

    out = pl.pallas_call(
        dueling_q_kernel,
        out_shape=jax.ShapeDtypeStruct((B_pad, OUT_LANES), jnp.float32),
        grid=grid,
        in_specs=[
            pl.BlockSpec((tb, N_OBS), lambda i: (i, 0)),          # x: pipelined per tile
            pl.BlockSpec((N_OBS, N_HID), lambda i: (0, 0)),       # weights: resident in VMEM
            pl.BlockSpec((1, N_HID), lambda i: (0, 0)),
            pl.BlockSpec((N_HID, 2 * N_HID), lambda i: (0, 0)),
            pl.BlockSpec((1, 2 * N_HID), lambda i: (0, 0)),
            pl.BlockSpec((2 * N_HID, OUT_LANES), lambda i: (0, 0)),
            pl.BlockSpec((1, OUT_LANES), lambda i: (0, 0)),
        ],
        out_specs=pl.BlockSpec((tb, OUT_LANES), lambda i: (i, 0)),
        compiler_params=pltpu.CompilerParams(
            dimension_semantics=("parallel",)),                   # v7x megacore; no-op v5e/v6e
        cost_estimate=pl.CostEstimate(
            flops=flops, transcendentals=0, bytes_accessed=bytes_accessed),
    )(x, w1, b1, wb, bb, wh, bh)

    # Valid rows only (pad rows produce harmless values and are dropped here,
    # so the torch.mean over exactly B*5 advantage elements is preserved).
    q_pre = out[:B, :N_ACT]            # v + a
    a_sum = jnp.sum(out[:B, N_ACT])    # sum of all B*5 advantage values
    return q_pre - a_sum / (B * N_ACT)


def init_params(key):
    """nn.Linear-style U(-1/sqrt(fan_in), 1/sqrt(fan_in)); weights stored (in, out)."""
    def linear(key, fan_in, fan_out):
        kw, kb = jax.random.split(key)
        bound = 1.0 / jnp.sqrt(jnp.float32(fan_in))
        w = jax.random.uniform(kw, (fan_in, fan_out), jnp.float32, -bound, bound)
        b = jax.random.uniform(kb, (1, fan_out), jnp.float32, -bound, bound)
        return w, b

    k1, k2, k3, k4, k5 = jax.random.split(key, 5)
    w1, b1 = linear(k1, N_OBS, N_HID)     # fc1
    wv, bv = linear(k2, N_HID, N_HID)     # fc_value
    wa, ba = linear(k3, N_HID, N_HID)     # fc_adv
    wvo, bvo = linear(k4, N_HID, 1)       # value
    wao, bao = linear(k5, N_HID, N_ACT)   # adv
    return (w1, b1, wv, bv, wa, ba, wvo, bvo, wao, bao)


def prepare_params(params):
    """Fuse + cast params for the kernel.
       branch fusion : [fc_value | fc_adv]            -> (128, 256)
       head fusion   : dueling combine folded into wh -> (256, 128) lane-padded
         col j (0..4) = [wvo | wao[:, j]],  col 5 = [0 | wao.sum(axis=1)]
         bh          = [bvo + bao_j ...,    sum(bao), 0...]
       Weights bf16 (MXU operands), biases f32 (VPU path)."""
    w1, b1, wv, bv, wa, ba, wvo, bvo, wao, bao = params

    wb = jnp.concatenate([wv, wa], axis=1)                       # (128, 256)
    bb = jnp.concatenate([bv, ba], axis=1)                       # (1, 256)

    wh = jnp.zeros((2 * N_HID, OUT_LANES), jnp.float32)
    wh = wh.at[:N_HID, 0:N_ACT].set(jnp.broadcast_to(wvo, (N_HID, N_ACT)))
    wh = wh.at[N_HID:, 0:N_ACT].set(wao)
    wh = wh.at[N_HID:, N_ACT].set(jnp.sum(wao, axis=1))          # row-sum(a) column

    bh = jnp.zeros((1, OUT_LANES), jnp.float32)
    bh = bh.at[0, 0:N_ACT].set(bvo[0, 0] + bao[0, :])
    bh = bh.at[0, N_ACT].set(jnp.sum(bao))

    return (w1.astype(MATMUL_DTYPE), b1,
            wb.astype(MATMUL_DTYPE), bb,
            wh.astype(MATMUL_DTYPE), bh)


def reference_forward(x, params):
    """Pure-JAX f32 reference matching the PyTorch forward exactly."""
    w1, b1, wv, bv, wa, ba, wvo, bvo, wao, bao = params
    h = jnp.maximum(x @ w1 + b1, 0.0)
    vh = jnp.maximum(h @ wv + bv, 0.0)
    ah = jnp.maximum(h @ wa + ba, 0.0)
    v = vh @ wvo + bvo
    a = ah @ wao + bao
    return v + a - jnp.mean(a)


def reference_forward_fused_bf16(x, kparams):
    """Pure-JAX replica of the exact kernel math (bf16 operands, f32 accumulate)."""
    w1, b1, wb, bb, wh, bh = kparams
    B = x.shape[0]
    h = jnp.maximum(jnp.dot(x.astype(MATMUL_DTYPE), w1,
                            preferred_element_type=jnp.float32) + b1, 0.0)
    hb = jnp.maximum(jnp.dot(h.astype(MATMUL_DTYPE), wb,
                             preferred_element_type=jnp.float32) + bb, 0.0)
    head = jnp.dot(hb.astype(MATMUL_DTYPE), wh,
                   preferred_element_type=jnp.float32) + bh
    q_pre = head[:, :N_ACT]
    a_sum = jnp.sum(head[:, N_ACT])
    return q_pre - a_sum / (B * N_ACT)


if __name__ == "__main__":
    key = jax.random.PRNGKey(0)
    k_params, k_x1, k_x2 = jax.random.split(key, 3)

    params = init_params(k_params)
    kparams = prepare_params(params)

    # Batched rollout case: 256 states -> tb=128, grid=(2,) (both v7x TCs busy),
    # no padding in the hot path, resident weights, one dense store per tile.
    x_big = jax.random.normal(k_x1, (256, N_OBS), dtype=jnp.float32)
    q_big = jax.block_until_ready(dueling_qnet_forward(x_big, kparams))
    assert q_big.shape == (256, N_ACT)
    assert bool(jnp.all(jnp.isfinite(q_big)))
    # tight check vs. the exact same fused/bf16 math in pure JAX (kernel correctness)
    assert jnp.allclose(q_big, reference_forward_fused_bf16(x_big, kparams),
                        atol=1e-3, rtol=1e-3)
    # loose check vs. full-f32 PyTorch-equivalent reference (bf16 matmul rounding)
    assert jnp.allclose(q_big, reference_forward(x_big, params), atol=5e-2, rtol=5e-2)

    # Small / ragged batch: exercises the pad-to-tile path (pad rows excluded from mean).
    x_small = jax.random.normal(k_x2, (19, N_OBS), dtype=jnp.float32)
    q_small = jax.block_until_ready(dueling_qnet_forward(x_small, kparams))
    assert q_small.shape == (19, N_ACT)
    assert bool(jnp.all(jnp.isfinite(q_small)))
    assert jnp.allclose(q_small, reference_forward_fused_bf16(x_small, kparams),
                        atol=1e-3, rtol=1e-3)
    assert jnp.allclose(q_small, reference_forward(x_small, params), atol=5e-2, rtol=5e-2)

    # TODO(synk): sample_action's epsilon-greedy branch is host-side Python control
    # flow, not part of the forward pass, so it is intentionally not a kernel.
    print("KERNEL_OK")
</pallas_src>

<mosaic_0001>
module attributes {stable_mosaic.version = 11 : i64} {
  func.func @dueling_q_kernel(%arg0: i32, %arg1: memref<128x23xf32, #tpu.memory_space<vmem>>, %arg2: memref<23x128xbf16, #tpu.memory_space<vmem>>, %arg3: memref<1x128xf32, #tpu.memory_space<vmem>>, %arg4: memref<128x256xbf16, #tpu.memory_space<vmem>>, %arg5: memref<1x256xf32, #tpu.memory_space<vmem>>, %arg6: memref<256x128xbf16, #tpu.memory_space<vmem>>, %arg7: memref<1x128xf32, #tpu.memory_space<vmem>>, %arg8: memref<128x128xf32, #tpu.memory_space<vmem>>) attributes {dimension_semantics = [#tpu.dimension_semantics<parallel>], iteration_bounds = array<i64: 2>, scalar_prefetch = 0 : i64, scratch_operands = 0 : i64, tpu.core_type = #tpu.core_type<tc>, window_params = [{transform_indices = @transform_0, window_bounds = array<i64: 128, 23>}, {pipeline_mode = #tpu.pipeline_mode<synchronous>, transform_indices = @transform_1, window_bounds = array<i64: 23, 128>}, {pipeline_mode = #tpu.pipeline_mode<synchronous>, transform_indices = @transform_2, window_bounds = array<i64: 1, 128>}, {pipeline_mode = #tpu.pipeline_mode<synchronous>, transform_indices = @transform_3, window_bounds = array<i64: 128, 256>}, {pipeline_mode = #tpu.pipeline_mode<synchronous>, transform_indices = @transform_4, window_bounds = array<i64: 1, 256>}, {pipeline_mode = #tpu.pipeline_mode<synchronous>, transform_indices = @transform_5, window_bounds = array<i64: 256, 128>}, {pipeline_mode = #tpu.pipeline_mode<synchronous>, transform_indices = @transform_6, window_bounds = array<i64: 1, 128>}, {transform_indices = @transform_7, window_bounds = array<i64: 128, 128>}]} {
    %c0 = arith.constant 0 : index
    %c0_0 = arith.constant 0 : index
    %0 = vector.load %arg1[%c0, %c0_0] : memref<128x23xf32, #tpu.memory_space<vmem>>, vector<128x23xf32>
    %1 = arith.truncf %0 : vector<128x23xf32> to vector<128x23xbf16>
    %c0_1 = arith.constant 0 : index
    %c0_2 = arith.constant 0 : index
    %2 = vector.load %arg2[%c0_1, %c0_2] : memref<23x128xbf16, #tpu.memory_space<vmem>>, vector<23x128xbf16>
    %cst = arith.constant dense<0.000000e+00> : vector<128x128xf32>
    %3 = tpu.matmul %1, %2, %cst {dimension_numbers = #tpu.dot_dimension_numbers<[1], [0], [0], [1], [0, 0, 1, 1], [], []>} : vector<128x23xbf16>, vector<23x128xbf16>, vector<128x128xf32> -> vector<128x128xf32>
    %c0_3 = arith.constant 0 : index
    %c0_4 = arith.constant 0 : index
    %4 = vector.load %arg3[%c0_3, %c0_4] : memref<1x128xf32, #tpu.memory_space<vmem>>, vector<1x128xf32>
    %5 = vector.broadcast %4 : vector<1x128xf32> to vector<128x128xf32>
    %6 = arith.addf %3, %5 : vector<128x128xf32>
    %cst_5 = arith.constant 0.000000e+00 : f32
    %7 = vector.broadcast %cst_5 : f32 to vector<128x128xf32>
    %8 = arith.maximumf %6, %7 : vector<128x128xf32>
    %9 = arith.truncf %8 : vector<128x128xf32> to vector<128x128xbf16>
    %c0_6 = arith.constant 0 : index
    %c0_7 = arith.constant 0 : index
    %10 = vector.load %arg4[%c0_6, %c0_7] : memref<128x256xbf16, #tpu.memory_space<vmem>>, vector<128x256xbf16>
    %cst_8 = arith.constant dense<0.000000e+00> : vector<128x256xf32>
    %11 = tpu.matmul %9, %10, %cst_8 {dimension_numbers = #tpu.dot_dimension_numbers<[1], [0], [0], [1], [0, 0, 1, 1], [], []>} : vector<128x128xbf16>, vector<128x256xbf16>, vector<128x256xf32> -> vector<128x256xf32>
    %c0_9 = arith.constant 0 : index
    %c0_10 = arith.constant 0 : index
    %12 = vector.load %arg5[%c0_9, %c0_10] : memref<1x256xf32, #tpu.memory_space<vmem>>, vector<1x256xf32>
    %13 = vector.broadcast %12 : vector<1x256xf32> to vector<128x256xf32>
    %14 = arith.addf %11, %13 : vector<128x256xf32>
    %cst_11 = arith.constant 0.000000e+00 : f32
    %15 = vector.broadcast %cst_11 : f32 to vector<128x256xf32>
    %16 = arith.maximumf %14, %15 : vector<128x256xf32>
    %17 = arith.truncf %16 : vector<128x256xf32> to vector<128x256xbf16>
    %c0_12 = arith.constant 0 : index
    %c0_13 = arith.constant 0 : index
    %18 = vector.load %arg6[%c0_12, %c0_13] : memref<256x128xbf16, #tpu.memory_space<vmem>>, vector<256x128xbf16>
    %cst_14 = arith.constant dense<0.000000e+00> : vector<128x128xf32>
    %19 = tpu.matmul %17, %18, %cst_14 {dimension_numbers = #tpu.dot_dimension_numbers<[1], [0], [0], [1], [0, 0, 1, 1], [], []>} : vector<128x256xbf16>, vector<256x128xbf16>, vector<128x128xf32> -> vector<128x128xf32>
    %c0_15 = arith.constant 0 : index
    %c0_16 = arith.constant 0 : index
    %20 = vector.load %arg7[%c0_15, %c0_16] : memref<1x128xf32, #tpu.memory_space<vmem>>, vector<1x128xf32>
    %21 = vector.broadcast %20 : vector<1x128xf32> to vector<128x128xf32>
    %22 = arith.addf %19, %21 : vector<128x128xf32>
    %c0_17 = arith.constant 0 : index
    %c0_18 = arith.constant 0 : index
    %23 = vector.load %arg8[%c0_17, %c0_18] : memref<128x128xf32, #tpu.memory_space<vmem>>, vector<128x128xf32>
    tpu.vector_store %arg8[%c0_17, %c0_18], %22 {strides = array<i32>} : memref<128x128xf32, #tpu.memory_space<vmem>>, vector<128x128xf32>,
    return
  }
  func.func @transform_0(%arg0: i32) -> (i32, i32) {
    %c0_i32 = arith.constant 0 : i32
    %c0_i32_0 = arith.constant 0 : i32
    return %arg0, %c0_i32 : i32, i32
  }
  func.func @transform_1(%arg0: i32) -> (i32, i32) {
    %c0_i32 = arith.constant 0 : i32
    %c0_i32_0 = arith.constant 0 : i32
    %c0_i32_1 = arith.constant 0 : i32
    return %c0_i32, %c0_i32_0 : i32, i32
  }
  func.func @transform_2(%arg0: i32) -> (i32, i32) {
    %c0_i32 = arith.constant 0 : i32
    %c0_i32_0 = arith.constant 0 : i32
    %c0_i32_1 = arith.constant 0 : i32
    return %c0_i32, %c0_i32_0 : i32, i32
  }
  func.func @transform_3(%arg0: i32) -> (i32, i32) {
    %c0_i32 = arith.constant 0 : i32
    %c0_i32_0 = arith.constant 0 : i32
    %c0_i32_1 = arith.constant 0 : i32
    return %c0_i32, %c0_i32_0 : i32, i32
  }
  func.func @transform_4(%arg0: i32) -> (i32, i32) {
    %c0_i32 = arith.constant 0 : i32
    %c0_i32_0 = arith.constant 0 : i32
    %c0_i32_1 = arith.constant 0 : i32
    return %c0_i32, %c0_i32_0 : i32, i32
  }
  func.func @transform_5(%arg0: i32) -> (i32, i32) {
    %c0_i32 = arith.constant 0 : i32
    %c0_i32_0 = arith.constant 0 : i32
    %c0_i32_1 = arith.constant 0 : i32
    return %c0_i32, %c0_i32_0 : i32, i32
  }
  func.func @transform_6(%arg0: i32) -> (i32, i32) {
    %c0_i32 = arith.constant 0 : i32
    %c0_i32_0 = arith.constant 0 : i32
    %c0_i32_1 = arith.constant 0 : i32
    return %c0_i32, %c0_i32_0 : i32, i32
  }
  func.func @transform_7(%arg0: i32) -> (i32, i32) {
    %c0_i32 = arith.constant 0 : i32
    %c0_i32_0 = arith.constant 0 : i32
    return %arg0, %c0_i32 : i32, i32
  }
}

</mosaic_0001>

<bundles_post_ra>
// kernel: tpu_custom_call.1
= control target key start
LH: loop header
LB: loop body
LE: loop exit
PB: predicated region body
PF: predicated region fallthrough
CT: control target
= control target key end

     0   :  { %12 = vsyncpa [#allocation3], 0  ;;  %s1739_s0 = inlined_call_operand.vmem [shape: f32[256,23], index: 0, kind: input, shape index: {}]   ;;  %s1740_s1 = inlined_call_operand.vmem [shape: bf16[23,128], index: 1, kind: input, shape index: {}]   ;;  %s1741_s2 = inlined_call_operand.vmem [shape: f32[1,128], index: 2, kind: input, shape index: {}]   ;;  %s1742_s3 = inlined_call_operand.vmem [shape: bf16[128,256], index: 3, kind: input, shape index: {}]   ;;  %s1743_s4 = inlined_call_operand.vmem [shape: f32[1,256], index: 4, kind: input, shape index: {}]   ;;  %s1744_s5 = inlined_call_operand.vmem [shape: bf16[256,128], index: 5, kind: input, shape index: {}]   ;;  %s1745_s6 = inlined_call_operand.vmem [shape: f32[1,128], index: 6, kind: input, shape index: {}]   ;;  %s1746_s7 = inlined_call_operand.hbm [shape: f32[256,128], index: 7, kind: output, shape index: {}]  }
   0x1   :  { %14 = vsyncpa [#allocation3 + $0x1], 0  ;;  %s1415_s24 = smov 0   ;;  %s1417_s25 = smov 0  }
   0x2   :  { %s1419_s26 = smov 0   ;;  %s1421_s27 = smov 0  }
   0x3 LB: > { %s1436_s28 = sadd.s32 4294967295, %s1368_s27   ;;  %s1070_s29 = sadd.s32 4294967294, %s1368_s27   ;;  %s1368_s27 = sphi %s1421_s27, %s1752_s27   ;;  %s1364_s26 = sphi %s1419_s26, %s1751_s26   ;;  %s1360_s25 = sphi %s1417_s25, %s1750_s25   ;;  %s1356_s24 = sphi %s1415_s24, %s1749_s24  }
   0x4   : > { %s1440_s30 = sadd.s32 1, %s1368_s27   ;;  %s179_s8 = sadd.s32 1, %s1364_s26 }
   0x5   : > { %s176_s9 = ssub.s32 %s1368_s27, %s1440_s30  ;;  %p189_p0 = scmp.ne.s32.totalorder %s1364_s26, %s1360_s25 }
   0x6   : > { %p177_p1 = scmp.eq.s32.totalorder %s176_s9, 0  ;;  %p190_p2 = scmp.eq.s32.totalorder %s1436_s28, 1 }
   0x7   : > { %p195_p3 = scmp.ne.s32.totalorder %s1360_s25, %s1356_s24  ;;  %p196_p4 = scmp.eq.s32.totalorder %s1070_s29, 1 }
   0x8   : > { %s1451_s10 = scalar_select %p177_p1, %s1364_s26, %s179_s8  }
   0x9   : > { %p1453_p5 = por %p190_p2, %p189_p0  ;;  %p1457_p6 = por %p196_p4, %p195_p3 }
   0xa   : > { %p1073_p7 = scmp.ge.s32.totalorder %s1368_s27, 1  ;;  %p241_p8 = scmp.lt.s32.totalorder %s1368_s27, 3 }
   0xc   : > { %p242_p9 = pnand %p1073_p7, %p241_p8 }
   0xd   : > { %v1264_v0 = vld [vmem:[%s1740_s1] sm:$0xff] (!%p242_p9)   ;;  %vm349_vm0 = vcmask (!%p242_p9), 1042432   ;;  %v1265_v1 = vld [vmem:[%s1740_s1 + $0x8] ss:$0 sps:$4 sm:$0xff] (!%p242_p9)   ;;  %vm350_vm1 = vcmask (!%p242_p9), 1043456   ;;  %v1370_v2 = vmov (!%p242_p9), 65535  }
   0xe   : > { %245 = sbr.rel (%p242_p9) target bundleno = 761 (0x2f9), region = 48  ;;  %1201 = vmatprep.subr.bf16.mxu0 (!%p242_p9), %v1264_v0  ;;  %v351_v3 = vsel (!%p242_p9), %vm349_vm0, 4294967295, %v1370_v2  ;;  %s1075_s17 = sshll.u32 (!%p242_p9), %s1436_s28, 4  ;;  %v1266_v5 = vld [vmem:[%s1742_s3 + $0x4] ss:$8 sps:$4 sm:$0xff] (!%p242_p9)   ;;  %vm324_vm2 = vcmask (!%p242_p9), 187392  }
   0xf   : > { %1202 = vmatpush3.bf16.msra.mxu0 (!%p242_p9), %v1264_v0  ;;  %v352_v4 = vsel (!%p242_p9), %vm350_vm1, %v351_v3, 0  ;;  %p274_p10 = scmp.lt.s32.totalorder (!%p242_p9), %s1075_s17, 31  ;;  %v1268_v6 = vld [vmem:[%s1742_s3] ss:$8 sps:$4 sm:$0xff] (!%p242_p9)   ;;  %v1269_v8 = vld [vmem:[%s1742_s3 + $0x14] ss:$8 sps:$4 sm:$0xff] (!%p242_p9)   ;;  %585 = vmatprep.subr.bf16.mxu1 (!%p242_p9), %v1266_v5 }
  0x10   : > { %v354_v7 = vand.u32 (!%p242_p9), %v1265_v1, %v352_v4  ;;  %586 = vmatpush1.bf16.msra.mxu1 (!%p242_p9), %v1268_v6  ;;  %v1271_v9 = vld [vmem:[%s1742_s3 + $0x10] ss:$8 sps:$4 sm:$0xff] (!%p242_p9)   ;;  %v1272_v10 = vld [vmem:[%s1742_s3 + $0x24] ss:$8 sps:$4 sm:$0xff] (!%p242_p9)   ;;  %v1274_v11 = vld [vmem:[%s1742_s3 + $0x20] ss:$8 sps:$4 sm:$0xff] (!%p242_p9)  }
  0x11   : > { %587 = vmatprep.subr.bf16.mxu1 (!%p242_p9), %v1269_v8  ;;  %v1275_v21 = vld [vmem:[%s1742_s3 + $0x34] ss:$8 sps:$4 sm:$0xff] (!%p242_p9)   ;;  %v1277_v23 = vld [vmem:[%s1742_s3 + $0x30] ss:$8 sps:$4 sm:$0xff] (!%p242_p9)   ;;  %v1278_v24 = vld [vmem:[%s1742_s3 + $0x44] ss:$8 sps:$4 sm:$0xff] (!%p242_p9)  }
  0x12   : > { %1203 = vmatprep.subr.bf16.mxu0 (!%p242_p9), %v354_v7  ;;  %v1280_v28 = vld [vmem:[%s1742_s3 + $0x40] ss:$8 sps:$4 sm:$0xff] (!%p242_p9)   ;;  %v1281_v30 = vld [vmem:[%s1742_s3 + $0x54] ss:$8 sps:$4 sm:$0xff] (!%p242_p9)   ;;  %v1283_v34 = vld [vmem:[%s1742_s3 + $0x50] ss:$8 sps:$4 sm:$0xff] (!%p242_p9)  }
  0x13   : > { %1204 = vmatpush3.bf16.msra.mxu0 (!%p242_p9), %v354_v7  ;;  %v1284_v42 = vld [vmem:[%s1742_s3 + $0x64] ss:$8 sps:$4 sm:$0xff] (!%p242_p9)   ;;  %v1286_v43 = vld [vmem:[%s1742_s3 + $0x60] ss:$8 sps:$4 sm:$0xff] (!%p242_p9)   ;;  %v1287_v44 = vld [vmem:[%s1742_s3 + $0x74] ss:$8 sps:$4 sm:$0xff] (!%p242_p9)  }
  0x14   : > { %588 = vmatpush1.bf16.msra.mxu1 (!%p242_p9), %v1271_v9  ;;  %v1289_v45 = vld [vmem:[%s1742_s3 + $0x70] ss:$8 sps:$4 sm:$0xff] (!%p242_p9)   ;;  %v1371_v46 = vmov (!%p242_p9), 0   ;;  %v1290_v47 = vld [vmem:[%s1744_s5 + $0x40] sm:$0xff] (!%p242_p9)   ;;  %v1292_v49 = vld [vmem:[%s1744_s5 + $0x48] sm:$0xff] (!%p242_p9)   ;;  %s270_s21 = sand.u32 (!%p242_p9), 1, %s1360_s25  }
  0x15   : > { %s1754_s17 = smov (!%p274_p10, %s1075_s17), 31  ;;  %589 = vmatprep.subr.bf16.mxu1 %v1272_v10  ;;  %617 = vmatprep.mubr.bf16.mxu1 %v1371_v46  ;;  %v1291_v48 = vld [vmem:[%s1744_s5] sm:$0xff]   ;;  %v1293_v50 = vld [vmem:[%s1744_s5 + $0x8] sm:$0xff]   ;;  %v1294_v51 = vld [vmem:[%s1744_s5 + $0x50] sm:$0xff]   ;;  %s1074_s22 = sshll.u32 %s270_s21, 7 }
  0x16   : > { %s1076_s9 = sshll.u32 %s1754_s17, 3  ;;  %1137 = vmatprep.subr.bf16.mxu0 %v1290_v47  ;;  %v1295_v52 = vld [vmem:[%s1744_s5 + $0x10] sm:$0xff]   ;;  %v1296_v53 = vld [vmem:[%s1744_s5 + $0x58] sm:$0xff]   ;;  %v1298_v55 = vld [vmem:[%s1744_s5 + $0x60] sm:$0xff]   ;;  %s1654_s8 = scalar_lea.vmem [#allocation2], %s1074_s22 }
  0x17   : > { %s1488_s18 = scalar_lea.vmem %s1739_s0, %s1076_s9  ;;  %v1297_v54 = vld [vmem:[%s1744_s5 + $0x18] sm:$0xff]   ;;  %v1299_v56 = vld [vmem:[%s1744_s5 + $0x20] sm:$0xff]   ;;  %v1300_v57 = vld [vmem:[%s1744_s5 + $0x68] sm:$0xff]   ;;  %s1126_s9 = sshll.u32 %s1436_s28, 11 }
  0x18   : > { %v281_v12 = vld [vmem:[%s1488_s18] sm:$0xff]  ;;  %v282_v13 = vld [vmem:[%s1488_s18 + $0x8] sm:$0xff]  ;;  %v283_v14 = vld [vmem:[%s1488_s18 + $0x10] sm:$0xff]  ;;  %590 = vmatpush1.bf16.msra.mxu1 %v1274_v11  ;;  %s1689_s15 = scalar_lea.hbm %s1746_s7, %s1126_s9  ;;  %s1698_s28 = scalar_lea.sflag [#allocation3], %s270_s21 }
  0x19   : > { %v297_v15 = vpack.c.bf16 %v282_v13, %v281_v12  ;;  %v284_v16 = vld [vmem:[%s1488_s18 + $0x18] sm:$0xff]  ;;  %v285_v17 = vld [vmem:[%s1488_s18 + $0x20] sm:$0xff]  ;;  %v286_v18 = vld [vmem:[%s1488_s18 + $0x28] sm:$0xff]  ;;  %591 = vmatprep.subr.bf16.mxu1 %v1275_v21  ;;  %s1372_s19 = smov [#allocation2]  }
  0x1a   : > { %v298_v19 = vpack.c.bf16 %v284_v16, %v283_v14  ;;  %v299_v20 = vpack.c.bf16 %v286_v18, %v285_v17  ;;  %v287_v22 = vld [vmem:[%s1488_s18 + $0x30] sm:$0xff]  ;;  %v288_v25 = vld [vmem:[%s1488_s18 + $0x38] sm:$0xff]  ;;  %v289_v26 = vld [vmem:[%s1488_s18 + $0x40] sm:$0xff]  ;;  %s1310_s20 = sshll.u32 %s1372_s19, 4  ;;  %s1311_s20 = int_to_ptr.vmem [resolvable:$false] %s1310_s20 }
  0x1b   : > { %1205 = vmatprep.mubr.msk.bf16.mxu0 %vm324_vm2, %v297_v15  ;;  %v290_v27 = vld [vmem:[%s1488_s18 + $0x48] sm:$0xff]  ;;  %v300_v29 = vpack.c.bf16 %v288_v25, %v287_v22  ;;  %v291_v32 = vld [vmem:[%s1488_s18 + $0x50] sm:$0xff]  ;;  %v292_v33 = vld [vmem:[%s1488_s18 + $0x58] sm:$0xff]  ;;  %s1312_s17 = scalar_lea.vmem %s1311_s20, 4096 }
  0x1c   : > { %1206 = vmatmul.mubr.msk.bf16.vlgmr.msra.gmra.mrb[0].mxu0 %vm324_vm2, %v298_v19  ;;  %v301_v31 = vpack.c.bf16 %v290_v27, %v289_v26  ;;  %592 = vmatpush1.bf16.msra.mxu1 %v1277_v23  ;;  %v293_v35 = vld [vmem:[%s1488_s18 + $0x60] sm:$0xff]  ;;  %v294_v36 = vld [vmem:[%s1488_s18 + $0x68] sm:$0xff]  ;;  %v302_v37 = vpack.c.bf16 %v292_v33, %v291_v32  ;;  %v295_v39 = vld [vmem:[%s1488_s18 + $0x70] sm:$0xff] }
  0x1d   : > { %1209 = vmatprep.mubr.msk.bf16.mxu0 %vm324_vm2, %v299_v20  ;;  %593 = vmatprep.subr.bf16.mxu1 %v1278_v24  ;;  %v303_v38 = vpack.c.bf16 %v294_v36, %v293_v35  ;;  %v296_v40 = vld [vmem:[%s1488_s18 + $0x78] sm:$0xff]  ;;  %v1301_v58 = vld [vmem:[%s1744_s5 + $0x28] sm:$0xff]   ;;  %v1077_v59 = vld [vmem:[%s1741_s2] ss:$0 sm:$0xff]  ;;  %s1008_s18 = sshll.u32 %s1654_s8, 4  ;;  %s1691_s18 = int_to_ptr.vmem [resolvable:$true] %s1008_s18 }
  0x1e   : > { %v304_v41 = vpack.c.bf16 %v296_v40, %v295_v39  ;;  %1138 = vmatpush3.bf16.msra.mxu0 %v1291_v48  ;;  %s1306_s16 = scalar_lea.vmem %s1691_s18, 2048  ;;  %p1313_p0 = scmp.lt.s32.totalorder %s1691_s18, %s1311_s20 }
  0x1f   : > { %1139 = vmatprep.subr.bf16.mxu0 %v1292_v49  ;;  %p1307_p11 = scmp.ne.s32.totalorder %s1691_s18, %s1306_s16  ;;  %p1314_p1 = scmp.lt.s32.totalorder %s1312_s17, %s1306_s16 }
  0x20   : > { %594 = vmatpush1.bf16.msra.mxu1 %v1280_v28 }
  0x21   : > { %595 = vmatprep.subr.bf16.mxu1 %v1281_v30  ;;  %p1308_p12 = pnand %p1307_p11, %p1453_p5  ;;  %p1315_p2 = por %p1314_p1, %p1313_p0 }
  0x22   : > { %1140 = vmatpush3.bf16.msra.mxu0 %v1293_v50 }
  0x23   : > { %1141 = vmatprep.subr.bf16.mxu0 %v1294_v51  ;;  %p1309_p13 = pneg %p1308_p12 }
  0x24   : > { %1210 = vmatmul.mubr.msk.bf16.gmra.mrb[4].mxu0 %vm324_vm2, %v300_v29  ;;  %596 = vmatpush1.bf16.msra.mxu1 %v1283_v34 }
  0x25   : > { %1213 = vmatprep.mubr.msk.bf16.mxu0 %vm324_vm2, %v301_v31  ;;  %597 = vmatprep.subr.bf16.mxu1 %v1284_v42  ;;  %p1316_p3 = pnand %p1315_p2, %p1309_p13 }
  0x26   : > { %1142 = vmatpush3.bf16.msra.mxu0 %v1295_v52 }
  0x27   : > { %1143 = vmatprep.subr.bf16.mxu0 %v1296_v53  ;;  %v1302_v53 = vld [vmem:[%s1744_s5 + $0x70] sm:$0xff]  }
  0x28   : > { %598 = vmatpush1.bf16.msra.mxu1 %v1286_v43 }
  0x29   : > { %599 = vmatprep.subr.bf16.mxu1 %v1287_v44 }
  0x2a   : > { %1144 = vmatpush3.bf16.msra.mxu0 %v1297_v54  ;;  %v1303_v54 = vld [vmem:[%s1744_s5 + $0x30] sm:$0xff]  }
  0x2b   : > { %1145 = vmatprep.subr.bf16.mxu0 %v1298_v55  ;;  %v1304_v55 = vld [vmem:[%s1744_s5 + $0x78] sm:$0xff]  }
  0x2c   : > { %1214 = vmatmul.mubr.msk.bf16.gmra.mrb[8].mxu0 %vm324_vm2, %v302_v37  ;;  %600 = vmatpush1.bf16.msra.mxu1 %v1289_v45 }
  0x2d   : > { %1217 = vmatprep.mubr.msk.bf16.mxu0 %vm324_vm2, %v303_v38 }
  0x2e   : > { %1146 = vmatpush3.bf16.msra.mxu0 %v1299_v56  ;;  %v1305_v56 = vld [vmem:[%s1744_s5 + $0x38] sm:$0xff]  }
  0x2f   : > { %1147 = vmatprep.subr.bf16.mxu0 %v1300_v57 }
  0x32   : > { %1148 = vmatpush3.bf16.msra.mxu0 %v1301_v58 }
  0x33   : > { %1149 = vmatprep.subr.bf16.mxu0 %v1302_v53 }
  0x34   : > { %1218 = vmatmul.mubr.msk.bf16.gmra.mrb[12].mxu0 %vm324_vm2, %v304_v41 }
  0x36   : > { %1150 = vmatpush3.bf16.msra.mxu0 %v1303_v54 }
  0x37   : > { %1151 = vmatprep.subr.bf16.mxu0 %v1304_v55 }
  0x3a   : > { %1152 = vmatpush3.bf16.msra.mxu0 %v1305_v56 }
  0xef   : > { %v1207_v60 = vpop.f32.mrb[0].mxu0 }
  0xf0   : > { %v399_v61 = vadd.f32 %v1207_v60, %v1077_v59  ;;  %v390_v62 = vpop.f32.mrb[1].mxu0 }
  0xf1   : > { %v391_v63 = vadd.f32 %v1077_v59, %v390_v62  ;;  %v1208_v0 = vpop.f32.mrb[2].mxu0 }
  0xf2   : > { %v402_v1 = vadd.f32 %v1208_v0, %v1077_v59  ;;  %v393_v2 = vpop.f32.mrb[3].mxu0  ;;  %v455_v4 = vmax.f32 %v399_v61, 0.0 }
  0xf3   : > { %v394_v3 = vadd.f32 %v1077_v59, %v393_v2  ;;  %v453_v6 = vmax.f32 %v391_v63, 0.0 }
  0xf4   : > { %v456_v5 = vmax.f32 %v402_v1, 0.0 }
  0xf5   : > { %v454_v7 = vmax.f32 %v394_v3, 0.0 }
  0xf6   : > { %v470_v8 = vpack.c.bf16 %v456_v5, %v455_v4 }
  0xf7   : > { %v469_v9 = vpack.c.bf16 %v454_v7, %v453_v6  ;;  %v1211_v10 = vpop.f32.mrb[4].mxu0 }
  0xf8   : > { %v415_v11 = vadd.f32 %v1211_v10, %v1077_v59  ;;  %v406_v12 = vpop.f32.mrb[5].mxu0 }
  0xf9   : > { %618 = vmatmul.mubr.bf16.vlgmr.msra.gmra.mrb[0].mxu1 %v469_v9  ;;  %v407_v13 = vadd.f32 %v1077_v59, %v406_v12  ;;  %v1212_v14 = vpop.f32.mrb[6].mxu0 }
  0xfa   : > { %v459_v15 = vmax.f32 %v415_v11, 0.0  ;;  %v418_v16 = vadd.f32 %v1212_v14, %v1077_v59  ;;  %v409_v17 = vpop.f32.mrb[7].mxu0  ;;  %627 = vmatprep.mubr.bf16.mxu1 %v1371_v46 }
  0xfb   : > { %v457_v18 = vmax.f32 %v407_v13, 0.0  ;;  %v410_v19 = vadd.f32 %v1077_v59, %v409_v17 }
  0xfc   : > { %v460_v20 = vmax.f32 %v418_v16, 0.0 }
  0xfd   : > { %v458_v21 = vmax.f32 %v410_v19, 0.0 }
  0xfe   : > { %v472_v22 = vpack.c.bf16 %v460_v20, %v459_v15 }
  0xff   : > { %v471_v23 = vpack.c.bf16 %v458_v21, %v457_v18  ;;  %v1215_v24 = vpop.f32.mrb[8].mxu0 }
 0x100   : > { %v431_v25 = vadd.f32 %v1215_v24, %v1077_v59  ;;  %v422_v26 = vpop.f32.mrb[9].mxu0 }
 0x101   : > { %628 = vmatmul.mubr.bf16.gmra.mrb[4].mxu1 %v470_v8  ;;  %v423_v27 = vadd.f32 %v1077_v59, %v422_v26  ;;  %v1216_v28 = vpop.f32.mrb[10].mxu0 }
 0x102   : > { %637 = vmatprep.mubr.bf16.mxu1 %v1371_v46  ;;  %v463_v29 = vmax.f32 %v431_v25, 0.0  ;;  %v434_v30 = vadd.f32 %v1216_v28, %v1077_v59  ;;  %v425_v31 = vpop.f32.mrb[11].mxu0 }
 0x103   : > { %v461_v32 = vmax.f32 %v423_v27, 0.0  ;;  %v426_v33 = vadd.f32 %v1077_v59, %v425_v31 }
 0x104   : > { %v464_v34 = vmax.f32 %v434_v30, 0.0 }
 0x105   : > { %v462_v35 = vmax.f32 %v426_v33, 0.0 }
 0x106   : > { %v474_v36 = vpack.c.bf16 %v464_v34, %v463_v29 }
 0x107   : > { %v473_v37 = vpack.c.bf16 %v462_v35, %v461_v32  ;;  %v1219_v38 = vpop.f32.mrb[12].mxu0 }
 0x108   : > { %v447_v39 = vadd.f32 %v1219_v38, %v1077_v59  ;;  %v438_v40 = vpop.f32.mrb[13].mxu0 }
 0x109   : > { %638 = vmatmul.mubr.bf16.gmra.mrb[8].mxu1 %v471_v23  ;;  %v439_v41 = vadd.f32 %v1077_v59, %v438_v40  ;;  %v1220_v42 = vpop.f32.mrb[14].mxu0 }
 0x10a   : > { %647 = vmatprep.mubr.bf16.mxu1 %v1371_v46  ;;  %v467_v43 = vmax.f32 %v447_v39, 0.0  ;;  %v450_v44 = vadd.f32 %v1220_v42, %v1077_v59  ;;  %v441_v45 = vpop.f32.mrb[15].mxu0 }
 0x10b   : > { %v465_v47 = vmax.f32 %v439_v41, 0.0  ;;  %v442_v48 = vadd.f32 %v1077_v59, %v441_v45  ;;  %v493_v59 = vld [vmem:[%s1743_s4] sm:$0x3] }
 0x10c   : > { %v468_v49 = vmax.f32 %v450_v44, 0.0 }
 0x10d   : > { %v466_v50 = vmax.f32 %v442_v48, 0.0 }
 0x10e   : > { %v476_v51 = vpack.c.bf16 %v468_v49, %v467_v43 }
 0x10f   : > { %v475_v52 = vpack.c.bf16 %v466_v50, %v465_v47 }
 0x111   : > { %648 = vmatmul.mubr.bf16.gmra.mrb[12].mxu1 %v472_v22 }
 0x112   : > { %657 = vmatprep.mubr.bf16.mxu1 %v1371_v46 }
 0x119   : > { %658 = vmatmul.mubr.bf16.gmra.mrb[16].mxu1 %v473_v37 }
 0x11a   : > { %667 = vmatprep.mubr.bf16.mxu1 %v1371_v46 }
 0x121   : > { %668 = vmatmul.mubr.bf16.gmra.mrb[20].mxu1 %v474_v36 }
 0x122   : > { %677 = vmatprep.mubr.bf16.mxu1 %v1371_v46 }
 0x129   : > { %678 = vmatmul.mubr.bf16.gmra.mrb[24].mxu1 %v475_v52 }
 0x12a   : > { %687 = vmatprep.mubr.bf16.mxu1 %v1371_v46  ;;  %v495_v46 = vlaneseq }
 0x12c   : > { %v496_v57 = vshrl.u32 %v495_v46, 7 }
 0x12e   : > { %v497_v58 = vsub.s32 0, %v496_v57  ;;  %v501_v60 = vsub.s32 1, %v496_v57 }
 0x130   : > { %v1609_v61 = vrot.slane %v493_v59, %v497_v58  ;;  %v1611_v62 = vrot.slane %v493_v59, %v501_v60 }
 0x131   : > { %688 = vmatmul.mubr.bf16.gmra.mrb[28].mxu1 %v476_v51 }
 0x1cc   : > { %v619_v63 = vpop.f32.mrb[0].mxu1 }
 0x1cd   : > { %v620_v0 = vadd.f32 %v619_v63, %v1609_v61  ;;  %v621_v1 = vpop.f32.mrb[1].mxu1 }
 0x1ce   : > { %v622_v2 = vadd.f32 %v621_v1, %v1611_v62  ;;  %v623_v3 = vpop.f32.mrb[2].mxu1 }
 0x1cf   : > { %v624_v4 = vadd.f32 %v623_v3, %v1609_v61  ;;  %v625_v5 = vpop.f32.mrb[3].mxu1  ;;  %v698_v7 = vmax.f32 %v620_v0, 0.0 }
 0x1d0   : > { %v626_v6 = vadd.f32 %v625_v5, %v1611_v62  ;;  %v699_v9 = vmax.f32 %v622_v2, 0.0 }
 0x1d1   : > { %v700_v8 = vmax.f32 %v624_v4, 0.0 }
 0x1d2   : > { %v701_v10 = vmax.f32 %v626_v6, 0.0 }
 0x1d3   : > { %v730_v11 = vpack.c.bf16 %v700_v8, %v698_v7 }
 0x1d4   : > { %v731_v12 = vpack.c.bf16 %v701_v10, %v699_v9  ;;  %v629_v13 = vpop.f32.mrb[4].mxu1 }
 0x1d5   : > { %v630_v14 = vadd.f32 %v629_v13, %v1609_v61  ;;  %v631_v15 = vpop.f32.mrb[5].mxu1 }
 0x1d6   : > { %v632_v16 = vadd.f32 %v631_v15, %v1611_v62  ;;  %v633_v17 = vpop.f32.mrb[6].mxu1  ;;  %913 = vmatprep.mubr.bf16.mxu0 %v731_v12 }
 0x1d7   : > { %v634_v18 = vadd.f32 %v633_v17, %v1609_v61  ;;  %v635_v19 = vpop.f32.mrb[7].mxu1  ;;  %914 = vmatmul.mubr.bf16.vlgmr.msra.gmra.mrb[16].mxu0 %v730_v11  ;;  %v702_v21 = vmax.f32 %v630_v14, 0.0 }
 0x1d8   : > { %v636_v20 = vadd.f32 %v635_v19, %v1611_v62  ;;  %v703_v23 = vmax.f32 %v632_v16, 0.0 }
 0x1d9   : > { %v704_v22 = vmax.f32 %v634_v18, 0.0 }
 0x1da   : > { %v705_v24 = vmax.f32 %v636_v20, 0.0 }
 0x1db   : > { %v732_v25 = vpack.c.bf16 %v704_v22, %v702_v21 }
 0x1dc   : > { %v733_v26 = vpack.c.bf16 %v705_v24, %v703_v23  ;;  %v639_v27 = vpop.f32.mrb[8].mxu1 }
 0x1dd   : > { %v640_v28 = vadd.f32 %v639_v27, %v1609_v61  ;;  %v641_v29 = vpop.f32.mrb[9].mxu1 }
 0x1de   : > { %v642_v30 = vadd.f32 %v641_v29, %v1611_v62  ;;  %v643_v31 = vpop.f32.mrb[10].mxu1  ;;  %921 = vmatprep.mubr.bf16.mxu0 %v733_v26 }
 0x1df   : > { %v644_v32 = vadd.f32 %v643_v31, %v1609_v61  ;;  %v645_v33 = vpop.f32.mrb[11].mxu1  ;;  %922 = vmatmul.mubr.bf16.gmra.mrb[20].mxu0 %v732_v25  ;;  %v706_v35 = vmax.f32 %v640_v28, 0.0 }
 0x1e0   : > { %v646_v34 = vadd.f32 %v645_v33, %v1611_v62  ;;  %v707_v37 = vmax.f32 %v642_v30, 0.0 }
 0x1e1   : > { %v708_v36 = vmax.f32 %v644_v32, 0.0 }
 0x1e2   : > { %v709_v38 = vmax.f32 %v646_v34, 0.0 }
 0x1e3   : > { %v734_v39 = vpack.c.bf16 %v708_v36, %v706_v35 }
 0x1e4   : > { %v735_v40 = vpack.c.bf16 %v709_v38, %v707_v37  ;;  %v649_v41 = vpop.f32.mrb[12].mxu1 }
 0x1e5   : > { %v650_v42 = vadd.f32 %v649_v41, %v1609_v61  ;;  %v651_v43 = vpop.f32.mrb[13].mxu1 }
 0x1e6   : > { %v652_v44 = vadd.f32 %v651_v43, %v1611_v62  ;;  %v653_v45 = vpop.f32.mrb[14].mxu1  ;;  %929 = vmatprep.mubr.bf16.mxu0 %v735_v40 }
 0x1e7   : > { %v654_v47 = vadd.f32 %v653_v45, %v1609_v61  ;;  %v655_v48 = vpop.f32.mrb[15].mxu1  ;;  %930 = vmatmul.mubr.bf16.gmra.mrb[24].mxu0 %v734_v39  ;;  %v710_v50 = vmax.f32 %v650_v42, 0.0 }
 0x1e8   : > { %v656_v49 = vadd.f32 %v655_v48, %v1611_v62  ;;  %v711_v52 = vmax.f32 %v652_v44, 0.0 }
 0x1e9   : > { %v712_v51 = vmax.f32 %v654_v47, 0.0 }
 0x1ea   : > { %v713_v53 = vmax.f32 %v656_v49, 0.0 }
 0x1eb   : > { %v736_v54 = vpack.c.bf16 %v712_v51, %v710_v50 }
 0x1ec   : > { %v737_v55 = vpack.c.bf16 %v713_v53, %v711_v52  ;;  %v659_v56 = vpop.f32.mrb[16].mxu1 }
 0x1ed   : > { %v660_v46 = vadd.f32 %v659_v56, %v1609_v61  ;;  %v661_v57 = vpop.f32.mrb[17].mxu1 }
 0x1ee   : > { %v662_v58 = vadd.f32 %v661_v57, %v1611_v62  ;;  %v663_v59 = vpop.f32.mrb[18].mxu1  ;;  %937 = vmatprep.mubr.bf16.mxu0 %v737_v55 }
 0x1ef   : > { %v664_v60 = vadd.f32 %v663_v59, %v1609_v61  ;;  %v665_v63 = vpop.f32.mrb[19].mxu1  ;;  %938 = vmatmul.mubr.bf16.gmra.mrb[28].mxu0 %v736_v54  ;;  %v714_v1 = vmax.f32 %v660_v46, 0.0 }
 0x1f0   : > { %v666_v0 = vadd.f32 %v665_v63, %v1611_v62  ;;  %v715_v3 = vmax.f32 %v662_v58, 0.0 }
 0x1f1   : > { %v716_v2 = vmax.f32 %v664_v60, 0.0 }
 0x1f2   : > { %v717_v4 = vmax.f32 %v666_v0, 0.0 }
 0x1f3   : > { %v738_v5 = vpack.c.bf16 %v716_v2, %v714_v1 }
 0x1f4   : > { %v739_v6 = vpack.c.bf16 %v717_v4, %v715_v3  ;;  %v669_v7 = vpop.f32.mrb[20].mxu1 }
 0x1f5   : > { %v670_v8 = vadd.f32 %v669_v7, %v1609_v61  ;;  %v671_v9 = vpop.f32.mrb[21].mxu1 }
 0x1f6   : > { %v672_v10 = vadd.f32 %v671_v9, %v1611_v62  ;;  %v673_v11 = vpop.f32.mrb[22].mxu1  ;;  %945 = vmatprep.mubr.bf16.mxu0 %v739_v6 }
 0x1f7   : > { %v674_v12 = vadd.f32 %v673_v11, %v1609_v61  ;;  %v675_v13 = vpop.f32.mrb[23].mxu1  ;;  %946 = vmatmul.mubr.bf16.gmra.mrb[32].mxu0 %v738_v5  ;;  %v718_v15 = vmax.f32 %v670_v8, 0.0 }
 0x1f8   : > { %v676_v14 = vadd.f32 %v675_v13, %v1611_v62  ;;  %v719_v17 = vmax.f32 %v672_v10, 0.0 }
 0x1f9   : > { %v720_v16 = vmax.f32 %v674_v12, 0.0 }
 0x1fa   : > { %v721_v18 = vmax.f32 %v676_v14, 0.0 }
 0x1fb   : > { %v740_v19 = vpack.c.bf16 %v720_v16, %v718_v15 }
 0x1fc   : > { %v741_v20 = vpack.c.bf16 %v721_v18, %v719_v17  ;;  %v679_v21 = vpop.f32.mrb[24].mxu1 }
 0x1fd   : > { %v680_v22 = vadd.f32 %v679_v21, %v1609_v61  ;;  %v681_v23 = vpop.f32.mrb[25].mxu1 }
 0x1fe   : > { %v682_v24 = vadd.f32 %v681_v23, %v1611_v62  ;;  %v683_v25 = vpop.f32.mrb[26].mxu1  ;;  %953 = vmatprep.mubr.bf16.mxu0 %v741_v20 }
 0x1ff   : > { %v684_v26 = vadd.f32 %v683_v25, %v1609_v61  ;;  %v685_v27 = vpop.f32.mrb[27].mxu1  ;;  %954 = vmatmul.mubr.bf16.gmra.mrb[36].mxu0 %v740_v19  ;;  %v722_v29 = vmax.f32 %v680_v22, 0.0 }
 0x200   : > { %v686_v28 = vadd.f32 %v685_v27, %v1611_v62  ;;  %v723_v31 = vmax.f32 %v682_v24, 0.0 }
 0x201   : > { %v724_v30 = vmax.f32 %v684_v26, 0.0 }
 0x202   : > { %v725_v32 = vmax.f32 %v686_v28, 0.0 }
 0x203   : > { %v742_v33 = vpack.c.bf16 %v724_v30, %v722_v29 }
 0x204   : > { %v743_v34 = vpack.c.bf16 %v725_v32, %v723_v31  ;;  %v689_v35 = vpop.f32.mrb[28].mxu1 }
 0x205   : > { %v690_v36 = vadd.f32 %v689_v35, %v1609_v61  ;;  %v691_v37 = vpop.f32.mrb[29].mxu1 }
 0x206   : > { %v692_v38 = vadd.f32 %v691_v37, %v1611_v62  ;;  %v693_v39 = vpop.f32.mrb[30].mxu1  ;;  %961 = vmatprep.mubr.bf16.mxu0 %v743_v34 }
 0x207   : > { %v694_v40 = vadd.f32 %v693_v39, %v1609_v61  ;;  %v695_v41 = vpop.f32.mrb[31].mxu1  ;;  %962 = vmatmul.mubr.bf16.gmra.mrb[40].mxu0 %v742_v33  ;;  %v726_v43 = vmax.f32 %v690_v36, 0.0  ;;  %v1651_v61 = vld [vmem:[%s1745_s6] ss:$0 sm:$0xff] }
 0x208   : > { %v696_v42 = vadd.f32 %v695_v41, %v1611_v62  ;;  %v727_v45 = vmax.f32 %v692_v38, 0.0 }
 0x209   : > { %v728_v44 = vmax.f32 %v694_v40, 0.0 }
 0x20a   : > { %v729_v47 = vmax.f32 %v696_v42, 0.0 }
 0x20b   : > { %v744_v48 = vpack.c.bf16 %v728_v44, %v726_v43 }
 0x20c   : > { %v745_v49 = vpack.c.bf16 %v729_v47, %v727_v45 }
 0x20e   : > { %969 = vmatprep.mubr.bf16.mxu0 %v745_v49 }
 0x20f   : > { %970 = vmatmul.mubr.bf16.gmra.mrb[44].mxu0 %v744_v48 }
 0x2aa   : > { %v1153_v50 = vpop.f32.mrb[16].mxu0 }
 0x2ab   : > { %v1154_v51 = vpop.f32.mrb[17].mxu0 }
 0x2ac   : > { %v1155_v52 = vadd.f32 %v1154_v51, %v1153_v50  ;;  %v1156_v62 = vpop.f32.mrb[18].mxu0 }
 0x2ad   : > { %v1157_v53 = vpop.f32.mrb[19].mxu0 }
 0x2ae   : > { %v916_v54 = vadd.f32 %v1155_v52, %v1651_v61  ;;  %v1158_v55 = vadd.f32 %v1157_v53, %v1156_v62 }
 0x2b0   : > { %978 = vst [vmem:[%s1654_s8] sm:$0xff] %v916_v54  ;;  %v919_v56 = vadd.f32 %v1158_v55, %v1651_v61 }
 0x2b2   : > { %979 = vst [vmem:[%s1654_s8 + $0x8] sm:$0xff] %v919_v56  ;;  %v1159_v46 = vpop.f32.mrb[20].mxu0 }
 0x2b3   : > { %v1160_v57 = vpop.f32.mrb[21].mxu0 }
 0x2b4   : > { %v1161_v58 = vadd.f32 %v1160_v57, %v1159_v46  ;;  %v1162_v59 = vpop.f32.mrb[22].mxu0 }
 0x2b5   : > { %v1163_v60 = vpop.f32.mrb[23].mxu0 }
 0x2b6   : > { %v924_v63 = vadd.f32 %v1161_v58, %v1651_v61  ;;  %v1164_v0 = vadd.f32 %v1163_v60, %v1162_v59 }
 0x2b8   : > { %980 = vst [vmem:[%s1654_s8 + $0x10] sm:$0xff] %v924_v63  ;;  %v927_v1 = vadd.f32 %v1164_v0, %v1651_v61 }
 0x2ba   : > { %981 = vst [vmem:[%s1654_s8 + $0x18] sm:$0xff] %v927_v1  ;;  %v1165_v2 = vpop.f32.mrb[24].mxu0 }
 0x2bb   : > { %v1166_v3 = vpop.f32.mrb[25].mxu0 }
 0x2bc   : > { %v1167_v4 = vadd.f32 %v1166_v3, %v1165_v2  ;;  %v1168_v5 = vpop.f32.mrb[26].mxu0 }
 0x2bd   : > { %v1169_v6 = vpop.f32.mrb[27].mxu0 }
 0x2be   : > { %v932_v7 = vadd.f32 %v1167_v4, %v1651_v61  ;;  %v1170_v8 = vadd.f32 %v1169_v6, %v1168_v5 }
 0x2c0   : > { %982 = vst [vmem:[%s1654_s8 + $0x20] sm:$0xff] %v932_v7  ;;  %v935_v9 = vadd.f32 %v1170_v8, %v1651_v61 }
 0x2c2   : > { %983 = vst [vmem:[%s1654_s8 + $0x28] sm:$0xff] %v935_v9  ;;  %v1171_v10 = vpop.f32.mrb[28].mxu0 }
 0x2c3   : > { %v1172_v11 = vpop.f32.mrb[29].mxu0 }
 0x2c4   : > { %v1173_v12 = vadd.f32 %v1172_v11, %v1171_v10  ;;  %v1174_v13 = vpop.f32.mrb[30].mxu0 }
 0x2c5   : > { %v1175_v14 = vpop.f32.mrb[31].mxu0 }
 0x2c6   : > { %v940_v15 = vadd.f32 %v1173_v12, %v1651_v61  ;;  %v1176_v16 = vadd.f32 %v1175_v14, %v1174_v13 }
 0x2c8   : > { %984 = vst [vmem:[%s1654_s8 + $0x30] sm:$0xff] %v940_v15  ;;  %v943_v17 = vadd.f32 %v1176_v16, %v1651_v61 }
 0x2ca   : > { %985 = vst [vmem:[%s1654_s8 + $0x38] sm:$0xff] %v943_v17  ;;  %v1177_v18 = vpop.f32.mrb[32].mxu0 }
 0x2cb   : > { %v1178_v19 = vpop.f32.mrb[33].mxu0 }
 0x2cc   : > { %v1179_v20 = vadd.f32 %v1178_v19, %v1177_v18  ;;  %v1180_v21 = vpop.f32.mrb[34].mxu0 }
 0x2cd   : > { %v1181_v22 = vpop.f32.mrb[35].mxu0 }
 0x2ce   : > { %v948_v23 = vadd.f32 %v1179_v20, %v1651_v61  ;;  %v1182_v24 = vadd.f32 %v1181_v22, %v1180_v21 }
 0x2d0   : > { %986 = vst [vmem:[%s1654_s8 + $0x40] sm:$0xff] %v948_v23  ;;  %v951_v25 = vadd.f32 %v1182_v24, %v1651_v61 }
 0x2d2   : > { %987 = vst [vmem:[%s1654_s8 + $0x48] sm:$0xff] %v951_v25  ;;  %v1183_v26 = vpop.f32.mrb[36].mxu0 }
 0x2d3   : > { %v1184_v27 = vpop.f32.mrb[37].mxu0 }
 0x2d4   : > { %v1185_v28 = vadd.f32 %v1184_v27, %v1183_v26  ;;  %v1186_v29 = vpop.f32.mrb[38].mxu0 }
 0x2d5   : > { %v1187_v30 = vpop.f32.mrb[39].mxu0 }
 0x2d6   : > { %v956_v31 = vadd.f32 %v1185_v28, %v1651_v61  ;;  %v1188_v32 = vadd.f32 %v1187_v30, %v1186_v29 }
 0x2d8   : > { %988 = vst [vmem:[%s1654_s8 + $0x50] sm:$0xff] %v956_v31  ;;  %v959_v33 = vadd.f32 %v1188_v32, %v1651_v61 }
 0x2da   : > { %989 = vst [vmem:[%s1654_s8 + $0x58] sm:$0xff] %v959_v33  ;;  %v1189_v34 = vpop.f32.mrb[40].mxu0 }
 0x2db   : > { %v1190_v35 = vpop.f32.mrb[41].mxu0 }
 0x2dc   : > { %v1191_v36 = vadd.f32 %v1190_v35, %v1189_v34  ;;  %v1192_v37 = vpop.f32.mrb[42].mxu0 }
 0x2dd   : > { %v1193_v38 = vpop.f32.mrb[43].mxu0 }
 0x2de   : > { %v964_v39 = vadd.f32 %v1191_v36, %v1651_v61  ;;  %v1194_v40 = vadd.f32 %v1193_v38, %v1192_v37 }
 0x2e0   : > { %990 = vst [vmem:[%s1654_s8 + $0x60] sm:$0xff] %v964_v39  ;;  %v967_v41 = vadd.f32 %v1194_v40, %v1651_v61 }
 0x2e2   : > { %991 = vst [vmem:[%s1654_s8 + $0x68] sm:$0xff] %v967_v41  ;;  %v1195_v42 = vpop.f32.mrb[44].mxu0 }
 0x2e3   : > { %v1196_v43 = vpop.f32.mrb[45].mxu0 }
 0x2e4   : > { %v1197_v44 = vadd.f32 %v1196_v43, %v1195_v42  ;;  %v1198_v45 = vpop.f32.mrb[46].mxu0 }
 0x2e5   : > { %v1199_v47 = vpop.f32.mrb[47].mxu0 }
 0x2e6   : > { %v972_v48 = vadd.f32 %v1197_v44, %v1651_v61  ;;  %v1200_v49 = vadd.f32 %v1199_v47, %v1198_v45 }
 0x2e8   : > { %992 = vst [vmem:[%s1654_s8 + $0x70] sm:$0xff] %v972_v48  ;;  %v975_v50 = vadd.f32 %v1200_v49, %v1651_v61 }
 0x2ea   : > { %993 = vst [vmem:[%s1654_s8 + $0x78] sm:$0xff] %v975_v50 }
 0x2eb   : > { %1319 = shalt.err (!%p1316_p3)
}
 0x2ec   : > { %s1320_s21 = scalar_lea.hbm %s1689_s15, 2048  ;;  %s1324_s29 = scalar_lea.hbm %s1746_s7, 4096 }
 0x2ed   : > { %p1321_p4 = scmp.ne.s32.totalorder %s1689_s15, %s1320_s21  ;;  %p1325_p9 = scmp.lt.u32.totalorder %s1689_s15, %s1746_s7 }
 0x2ee   : > { %p1326_p10 = scmp.lt.u32.totalorder %s1324_s29, %s1320_s21  ;;  %p1328_p12 = scmp.lt.u32.totalorder %s1320_s21, %s1689_s15 }
 0x2ef   : > { %p1322_p7 = pnand %p1321_p4, %p1453_p5 }
 0x2f0   : > { %p1327_p11 = por %p1326_p10, %p1325_p9 }
 0x2f1   : > { %p1323_p8 = pneg %p1322_p7 }
 0x2f2   : > { %p1329_p13 = por %p1328_p12, %p1327_p11 }
 0x2f4   : > { %p1330_p0 = pnand %p1329_p13, %p1323_p8 }
 0x2f6   : > { %1333 = shalt.err (!%p1330_p0)
}
 0x2f7   : > { %s1373_s13 = smov 128   ;;  %s1374_s14 = smov 8  }
 0x2f8   : > { %1221 = dma.vmem_to_hbm [thread:$0]  (%p1453_p5), %s1691_s18, 2048, %s1689_s15, %s1698_s28, %s1373_s13, %s1373_s13, %s1374_s14  }
 0x2f9 PF: > { %p1227_p1 = scmp.ge.s32.totalorder %s1368_s27, 2  ;;  %s1023_s16 = sand.u32 1, %s1356_s24  }
 0x2fa   : > { %s1024_s19 = scalar_lea.sflag [#allocation3], %s1023_s16 }
 0x2fb   : > { %p1224_p2 = pnand %p1227_p1, %p1457_p6 }
 0x2fd   : > { %1351 = dma.done.wait (!%p1224_p2), %s1024_s19, 2048  }
 0x2fe   : > { %1353 = vsyncadd (!%p1224_p2), %s1024_s19, 4294965248  ;;  %p17_p3 = scmp.ge.s32.totalorder %s1440_s30, 4   ;;  %s1749_s24 = smov %s1360_s25 }
 0x2ff   : > { %s1750_s25 = smov %s1364_s26  ;;  %s1751_s26 = smov %s1451_s10 }
 0x300   : > { %s1752_s27 = smov %s1440_s30  ;;  %19 = sbr.rel (!%p17_p3) target bundleno = 3 (0x3), region = 83 }
 0x307   :  { %1029 = vsyncpa [#allocation3], 1 }
 0x308   :  { %1031 = vsyncpa [#allocation3 + $0x1], 1 }

</bundles_post_ra>
